<compile_context>
chip_gen: v7x
topology: tpu7x:2x2x1
jax: 0.10.0
libtpu: 0.0.40
codegen_flags: <defaults>
</compile_context>

<pallas_src>
import functools

import jax
import jax.numpy as jnp
from jax.experimental import pallas as pl
from jax.experimental.pallas import tpu as pltpu

PROJ_DIM = 64      # logical feature width (matches the PyTorch module default)
PAD_DIM = 128      # lane-dense padded feature width (one full vreg lane row)


def _round_up(n, m):
    return ((n + m - 1) // m) * m


def predictor_kernel(x_ref, w1_ref, w2_ref, o_ref):
    # relu(x @ W1p) @ W2p with biases already folded into W1p / W2p
    # (see pack_predictor_params). f32 accumulation on the MXU, ReLU in f32.
    h = jnp.dot(x_ref[...], w1_ref[...], preferred_element_type=jnp.float32)
    h = jnp.maximum(h, 0.0).astype(w2_ref.dtype)
    y = jnp.dot(h, w2_ref[...], preferred_element_type=jnp.float32)
    o_ref[...] = y.astype(o_ref.dtype)


def pack_predictor_params(w1, b1, w2, b2, *, pad_dim=PAD_DIM,
                          compute_dtype=jnp.float32):
    """Pack (in,out)-layout weights + biases into padded, bias-augmented weights.

    The kernel input x is augmented with a constant 1.0 column at index D, so:
      W1p[:D,:D] = W1, W1p[D,:D] = b1, W1p[D,D] = 1  ->  h[:, :D] = x@W1 + b1,
                                                         h[:, D]  = relu(1) = 1
      W2p[:D,:D] = W2, W2p[D,:D] = b2                ->  y[:, :D] = h@W2 + b2
    All other padded entries are zero, so the padded lanes stay exactly 0.
    """
    d = w1.shape[0]
    assert d + 1 <= pad_dim
    w1p = jnp.zeros((pad_dim, pad_dim), jnp.float32)
    w1p = w1p.at[:d, :d].set(w1.astype(jnp.float32))
    w1p = w1p.at[d, :d].set(b1.reshape(-1).astype(jnp.float32))
    w1p = w1p.at[d, d].set(1.0)  # carries the ones column through the ReLU
    w2p = jnp.zeros((pad_dim, pad_dim), jnp.float32)
    w2p = w2p.at[:d, :d].set(w2.astype(jnp.float32))
    w2p = w2p.at[d, :d].set(b2.reshape(-1).astype(jnp.float32))
    return w1p.astype(compute_dtype), w2p.astype(compute_dtype)


@functools.partial(jax.jit, static_argnames=("block_rows",))
def predictor_forward(x, w1p, w2p, *, block_rows=512):
    """x: (B, D) logical input; w1p/w2p: (PAD_DIM, PAD_DIM) packed weights."""
    B, D = x.shape
    Dp = w1p.shape[0]
    cdt = w1p.dtype  # compute dtype (f32 or bf16 operands)

    # Lane-dense, bias-augmented input: [x, 1, 0, ..., 0] -> (B, Dp)
    xa = jnp.concatenate(
        [x.astype(cdt),
         jnp.ones((B, 1), cdt),
         jnp.zeros((B, Dp - D - 1), cdt)],
        axis=1)

    # Large batch tile: a single grid step for small batches, 512-row tiles
    # otherwise (tiny tiles were pure per-step pipeline overhead).
    bm = min(block_rows, _round_up(B, 8))
    Bp = _round_up(B, bm)
    if Bp != B:
        xa = jnp.pad(xa, ((0, Bp - B), (0, 0)))

    nbytes = (xa.size * xa.dtype.itemsize
              + w1p.size * w1p.dtype.itemsize
              + w2p.size * w2p.dtype.itemsize
              + Bp * Dp * jnp.dtype(x.dtype).itemsize)

    yp = pl.pallas_call(
        predictor_kernel,
        out_shape=jax.ShapeDtypeStruct((Bp, Dp), x.dtype),
        grid_spec=pltpu.PrefetchScalarGridSpec(
            num_scalar_prefetch=0,
            grid=(Bp // bm,),
            in_specs=[
                pl.BlockSpec((bm, Dp), lambda i: (i, 0)),  # x tile (pipelined)
                pl.BlockSpec((Dp, Dp), lambda i: (0, 0)),  # W1p (constant block, fetched once)
                pl.BlockSpec((Dp, Dp), lambda i: (0, 0)),  # W2p (constant block, fetched once)
            ],
            out_specs=pl.BlockSpec((bm, Dp), lambda i: (i, 0)),
        ),
        compiler_params=pltpu.CompilerParams(
            dimension_semantics=("parallel",),
        ),
        cost_estimate=pl.CostEstimate(
            flops=4 * Bp * Dp * Dp,
            transcendentals=0,
            bytes_accessed=nbytes,
        ),
    )(xa, w1p, w2p)

    return yp[:B, :D]


def init_predictor_params(key, proj_dim=PROJ_DIM, dtype=jnp.float32):
    """Deterministic init mimicking PyTorch nn.Linear default (uniform +-1/sqrt(in)).

    Weights are stored as (in_features, out_features), i.e. transpose of torch's
    (out, in), so y = x @ W + b matches torch's x @ W.T + b.
    """
    k1, k2, k3, k4 = jax.random.split(key, 4)
    bound = 1.0 / jnp.sqrt(jnp.array(proj_dim, dtype))
    w1 = jax.random.uniform(k1, (proj_dim, proj_dim), dtype, -bound, bound)
    b1 = jax.random.uniform(k2, (1, proj_dim), dtype, -bound, bound)
    w2 = jax.random.uniform(k3, (proj_dim, proj_dim), dtype, -bound, bound)
    b2 = jax.random.uniform(k4, (1, proj_dim), dtype, -bound, bound)
    return w1, b1, w2, b2


def predictor_reference(x, w1, b1, w2, b2):
    h = jnp.maximum(x @ w1 + b1, 0.0)
    return h @ w2 + b2


if __name__ == "__main__":
    proj_dim = PROJ_DIM
    batch = 8

    key = jax.random.PRNGKey(0)
    kx, kp = jax.random.split(key)
    x = jax.random.normal(kx, (batch, proj_dim), jnp.float32)
    w1, b1, w2, b2 = init_predictor_params(kp, proj_dim)

    # --- f32 path: exact module semantics ------------------------------------
    w1p_f32, w2p_f32 = pack_predictor_params(w1, b1, w2, b2,
                                             compute_dtype=jnp.float32)
    out_f32 = jax.block_until_ready(predictor_forward(x, w1p_f32, w2p_f32))
    ref_f32 = predictor_reference(x, w1, b1, w2, b2)
    assert out_f32.shape == (batch, proj_dim)
    assert out_f32.dtype == x.dtype
    assert jnp.allclose(out_f32, ref_f32, atol=1e-4, rtol=1e-4)

    # --- bf16 path: bf16 MXU operands, f32 accumulation (v6e/v7x fast path) ---
    w1p_bf16, w2p_bf16 = pack_predictor_params(w1, b1, w2, b2,
                                               compute_dtype=jnp.bfloat16)
    out_bf16 = jax.block_until_ready(predictor_forward(x, w1p_bf16, w2p_bf16))
    f32 = jnp.float32
    ref_bf16 = predictor_reference(
        x.astype(jnp.bfloat16).astype(f32),
        w1.astype(jnp.bfloat16).astype(f32),
        b1.astype(jnp.bfloat16).astype(f32),
        w2.astype(jnp.bfloat16).astype(f32),
        b2.astype(jnp.bfloat16).astype(f32))
    assert out_bf16.shape == (batch, proj_dim)
    assert jnp.allclose(out_bf16, ref_bf16, atol=2e-2, rtol=2e-2)

    print("KERNEL_OK")
</pallas_src>

<mosaic_0001>
module attributes {stable_mosaic.version = 11 : i64} {
  func.func @predictor_kernel(%arg0: i32, %arg1: memref<8x128xf32, #tpu.memory_space<vmem>>, %arg2: memref<128x128xf32, #tpu.memory_space<vmem>>, %arg3: memref<128x128xf32, #tpu.memory_space<vmem>>, %arg4: memref<8x128xf32, #tpu.memory_space<vmem>>) attributes {dimension_semantics = [#tpu.dimension_semantics<parallel>], iteration_bounds = array<i64: 1>, scalar_prefetch = 0 : i64, scratch_operands = 0 : i64, tpu.core_type = #tpu.core_type<tc>, window_params = [{transform_indices = @transform_0, window_bounds = array<i64: 8, 128>}, {pipeline_mode = #tpu.pipeline_mode<synchronous>, transform_indices = @transform_1, window_bounds = array<i64: 128, 128>}, {pipeline_mode = #tpu.pipeline_mode<synchronous>, transform_indices = @transform_2, window_bounds = array<i64: 128, 128>}, {transform_indices = @transform_3, window_bounds = array<i64: 8, 128>}]} {
    %c0 = arith.constant 0 : index
    %c0_0 = arith.constant 0 : index
    %0 = vector.load %arg1[%c0, %c0_0] : memref<8x128xf32, #tpu.memory_space<vmem>>, vector<8x128xf32>
    %c0_1 = arith.constant 0 : index
    %c0_2 = arith.constant 0 : index
    %1 = vector.load %arg2[%c0_1, %c0_2] : memref<128x128xf32, #tpu.memory_space<vmem>>, vector<128x128xf32>
    %cst = arith.constant dense<0.000000e+00> : vector<8x128xf32>
    %2 = tpu.matmul %0, %1, %cst {dimension_numbers = #tpu.dot_dimension_numbers<[1], [0], [0], [1], [0, 0, 1, 1], [], []>} : vector<8x128xf32>, vector<128x128xf32>, vector<8x128xf32> -> vector<8x128xf32>
    %cst_3 = arith.constant 0.000000e+00 : f32
    %3 = vector.broadcast %cst_3 : f32 to vector<8x128xf32>
    %4 = arith.maximumf %2, %3 : vector<8x128xf32>
    %c0_4 = arith.constant 0 : index
    %c0_5 = arith.constant 0 : index
    %5 = vector.load %arg3[%c0_4, %c0_5] : memref<128x128xf32, #tpu.memory_space<vmem>>, vector<128x128xf32>
    %cst_6 = arith.constant dense<0.000000e+00> : vector<8x128xf32>
    %6 = tpu.matmul %4, %5, %cst_6 {dimension_numbers = #tpu.dot_dimension_numbers<[1], [0], [0], [1], [0, 0, 1, 1], [], []>} : vector<8x128xf32>, vector<128x128xf32>, vector<8x128xf32> -> vector<8x128xf32>
    %c0_7 = arith.constant 0 : index
    %c0_8 = arith.constant 0 : index
    %7 = vector.load %arg4[%c0_7, %c0_8] : memref<8x128xf32, #tpu.memory_space<vmem>>, vector<8x128xf32>
    tpu.vector_store %arg4[%c0_7, %c0_8], %6 {strides = array<i32>} : memref<8x128xf32, #tpu.memory_space<vmem>>, vector<8x128xf32>,
    return
  }
  func.func @transform_0(%arg0: i32) -> (i32, i32) {
    %c0_i32 = arith.constant 0 : i32
    %c0_i32_0 = arith.constant 0 : i32
    return %arg0, %c0_i32 : i32, i32
  }
  func.func @transform_1(%arg0: i32) -> (i32, i32) {
    %c0_i32 = arith.constant 0 : i32
    %c0_i32_0 = arith.constant 0 : i32
    %c0_i32_1 = arith.constant 0 : i32
    return %c0_i32, %c0_i32_0 : i32, i32
  }
  func.func @transform_2(%arg0: i32) -> (i32, i32) {
    %c0_i32 = arith.constant 0 : i32
    %c0_i32_0 = arith.constant 0 : i32
    %c0_i32_1 = arith.constant 0 : i32
    return %c0_i32, %c0_i32_0 : i32, i32
  }
  func.func @transform_3(%arg0: i32) -> (i32, i32) {
    %c0_i32 = arith.constant 0 : i32
    %c0_i32_0 = arith.constant 0 : i32
    return %arg0, %c0_i32 : i32, i32
  }
}

</mosaic_0001>

<bundles_post_ra>
// kernel: predictor_forward.1
= control target key start
LH: loop header
LB: loop body
LE: loop exit
PB: predicated region body
PF: predicated region fallthrough
CT: control target
= control target key end

     0   :  { %8 = vsyncpa [#allocation3], 0  ;;  %s549_s0 = inlined_call_operand.vmem [shape: f32[8,128], index: 0, kind: input, shape index: {}]   ;;  %s550_s1 = inlined_call_operand.hbm [shape: f32[128,128], index: 1, kind: input, shape index: {}]   ;;  %s551_s2 = inlined_call_operand.hbm [shape: f32[128,128], index: 2, kind: input, shape index: {}]   ;;  %s552_s3 = inlined_call_operand.hbm [shape: f32[8,128], index: 3, kind: output, shape index: {}]  }
   0x1   :  { %9 = vsyncpa [#allocation6], 0 }
   0x2   :  { %10 = vsyncpa [#allocation4], 0  ;;  %s466_s12 = smov [#allocation2]   ;;  %s394_s16 = scalar_lea.hbm %s550_s1, 2048 }
   0x3   :  { %s18_s13 = sshll.u32 %s466_s12, 4  ;;  %p395_p0 = scmp.ne.s32.totalorder %s550_s1, %s394_s16  ;;  %s19_s13 = int_to_ptr.vmem [resolvable:$true] %s18_s13 }
   0x4   :  { %p398_p1 = scmp.lt.u32.totalorder %s394_s16, %s550_s1 }
   0x6   :  { %p400_p2 = pnand %p398_p1, %p395_p0 }
   0x8   :  { %403 = shalt.err (!%p400_p2)
}
   0x9   :  { %s404_s21 = scalar_lea.vmem %s19_s13, 2048  ;;  %p409_p4 = scmp.lt.s32.totalorder %s19_s13, %s19_s13 }
   0xa   :  { %p405_p3 = scmp.ne.s32.totalorder %s19_s13, %s404_s21  ;;  %p410_p5 = scmp.lt.s32.totalorder %s404_s21, %s404_s21 }
   0xc   :  { %p411_p6 = por %p410_p5, %p409_p4 }
   0xe   :  { %p412_p7 = pnand %p411_p6, %p405_p3 }
  0x10   :  { %415 = shalt.err (!%p412_p7)
}
  0x11   :  { %s467_s22 = smov 128   ;;  %s468_s23 = smov 8  }
  0x12   :  { %24 = dma.hbm_to_vmem [thread:$0]  %s550_s1, 2048, %s19_s13, [#allocation3], %s467_s22, %s467_s22, %s468_s23  }
  0x13   :  { %s469_s26 = smov [#allocation5]   ;;  %s416_s30 = scalar_lea.hbm %s551_s2, 2048 }
  0x14   :  { %s30_s27 = sshll.u32 %s469_s26, 4  ;;  %p417_p8 = scmp.ne.s32.totalorder %s551_s2, %s416_s30  ;;  %s31_s27 = int_to_ptr.vmem [resolvable:$true] %s30_s27 }
  0x15   :  { %p420_p9 = scmp.lt.u32.totalorder %s416_s30, %s551_s2 }
  0x17   :  { %p422_p10 = pnand %p420_p9, %p417_p8 }
  0x19   :  { %425 = shalt.err (!%p422_p10)
}
  0x1a   :  { %s426_s8 = scalar_lea.vmem %s31_s27, 2048  ;;  %p431_p12 = scmp.lt.s32.totalorder %s31_s27, %s31_s27 }
  0x1b   :  { %p427_p11 = scmp.ne.s32.totalorder %s31_s27, %s426_s8  ;;  %p432_p13 = scmp.lt.s32.totalorder %s426_s8, %s426_s8 }
  0x1d   :  { %p433_p0 = por %p432_p13, %p431_p12 }
  0x1f   :  { %p434_p1 = pnand %p433_p0, %p427_p11 }
  0x21   :  { %437 = shalt.err (!%p434_p1)
}
  0x22   :  { %36 = dma.hbm_to_vmem [thread:$0]  %s551_s2, 2048, %s31_s27, [#allocation6], %s467_s22, %s467_s22, %s468_s23  }
  0x23   :  { %460 = dma.done.wait [#allocation3], 2048  }
  0x24   :  { %461 = vsyncadd [#allocation3], 4294965248 }
  0x25   :  { %462 = dma.done.wait [#allocation6], 2048  }
  0x26   :  { %463 = vsyncadd [#allocation6], 4294965248  ;;  %v470_v0 = vmov 0.0|0.0   ;;  %vm471_vm0 = vmmov 0   ;;  %v472_v1 = vmov 0.0   ;;  %v44_v2 = vld [vmem:[#allocation2] sm:$0xff] }
  0x27   :  { %338 = vmatprep.subr.bf16.mxu0 %v470_v0  ;;  %300 = vmatprep.mubr.msk.f32.mxu0 %vm471_vm0, %v472_v1  ;;  %v45_v3 = vld [vmem:[#allocation2 + $0x8] sm:$0xff]  ;;  %v46_v4 = vld [vmem:[#allocation2 + $0x10] sm:$0xff]  ;;  %v47_v6 = vld [vmem:[#allocation2 + $0x18] sm:$0xff]  ;;  %s473_s11 = smov [#allocation7]  }
  0x28   :  { %362 = vmatprep.subr.bf16.mxu1 %v470_v0  ;;  %335 = vmatprep.mubr.msk.f32.mxu1 %vm471_vm0, %v472_v1  ;;  %v339_v5 = vpack.c.bf16 %v45_v3, %v44_v2  ;;  %v342_v7 = vpack.c.bf16 %v47_v6, %v46_v4  ;;  %v48_v8 = vld [vmem:[#allocation2 + $0x20] sm:$0xff]  ;;  %v49_v9 = vld [vmem:[#allocation2 + $0x28] sm:$0xff]  ;;  %v133_v12 = vld [vmem:[#allocation5 + $0x10] sm:$0xff]  ;;  %s224_s12 = sshll.u32 %s473_s11, 4  ;;  %s225_s12 = int_to_ptr.vmem [resolvable:$true] %s224_s12 }
  0x29   :  { %v131_v10 = vld [vmem:[#allocation5] sm:$0xff]  ;;  %v132_v11 = vld [vmem:[#allocation5 + $0x8] sm:$0xff]  ;;  %v134_v13 = vld [vmem:[#allocation5 + $0x18] sm:$0xff]  ;;  %v345_v14 = vpack.c.bf16 %v49_v9, %v48_v8  ;;  %s438_s13 = scalar_lea.vmem %s225_s12, 128  ;;  %p443_p3 = scmp.lt.s32.totalorder %s225_s12, %s225_s12 }
  0x2a   :  { %340 = vmatpush3.bf16.msra.mxu0 %v339_v5  ;;  %v363_v15 = vpack.c.bf16 %v132_v11, %v131_v10  ;;  %v50_v16 = vld [vmem:[#allocation2 + $0x30] sm:$0xff]  ;;  %v51_v17 = vld [vmem:[#allocation2 + $0x38] sm:$0xff]  ;;  %v366_v18 = vpack.c.bf16 %v134_v13, %v133_v12  ;;  %v135_v19 = vld [vmem:[#allocation5 + $0x20] sm:$0xff]  ;;  %p439_p2 = scmp.ne.s32.totalorder %s225_s12, %s438_s13  ;;  %p444_p4 = scmp.lt.s32.totalorder %s438_s13, %s438_s13 }
  0x2b   :  { %341 = vmatprep.subr.bf16.mxu0 %v470_v0  ;;  %v136_v20 = vld [vmem:[#allocation5 + $0x28] sm:$0xff]  ;;  %v348_v21 = vpack.c.bf16 %v51_v17, %v50_v16  ;;  %v52_v22 = vld [vmem:[#allocation2 + $0x40] sm:$0xff]  ;;  %v137_v25 = vld [vmem:[#allocation5 + $0x30] sm:$0xff] }
  0x2c   :  { %364 = vmatpush3.bf16.msra.mxu1 %v363_v15  ;;  %v53_v23 = vld [vmem:[#allocation2 + $0x48] sm:$0xff]  ;;  %v369_v24 = vpack.c.bf16 %v136_v20, %v135_v19  ;;  %v138_v26 = vld [vmem:[#allocation5 + $0x38] sm:$0xff]  ;;  %v54_v28 = vld [vmem:[#allocation2 + $0x50] sm:$0xff]  ;;  %p445_p5 = por %p444_p4, %p443_p3 }
  0x2d   :  { %365 = vmatprep.subr.bf16.mxu1 %v470_v0  ;;  %v351_v27 = vpack.c.bf16 %v53_v23, %v52_v22  ;;  %v55_v29 = vld [vmem:[#allocation2 + $0x58] sm:$0xff]  ;;  %v372_v30 = vpack.c.bf16 %v138_v26, %v137_v25  ;;  %v139_v31 = vld [vmem:[#allocation5 + $0x40] sm:$0xff]  ;;  %v140_v32 = vld [vmem:[#allocation5 + $0x48] sm:$0xff] }
  0x2e   :  { %343 = vmatpush3.bf16.msra.mxu0 %v342_v7  ;;  %v354_v33 = vpack.c.bf16 %v55_v29, %v54_v28  ;;  %v56_v34 = vld [vmem:[#allocation2 + $0x60] sm:$0xff]  ;;  %v57_v35 = vld [vmem:[#allocation2 + $0x68] sm:$0xff]  ;;  %v375_v36 = vpack.c.bf16 %v140_v32, %v139_v31  ;;  %v141_v37 = vld [vmem:[#allocation5 + $0x50] sm:$0xff]  ;;  %p446_p6 = pnand %p445_p5, %p439_p2 }
  0x2f   :  { %344 = vmatprep.subr.bf16.mxu0 %v470_v0  ;;  %v142_v38 = vld [vmem:[#allocation5 + $0x58] sm:$0xff]  ;;  %v357_v39 = vpack.c.bf16 %v57_v35, %v56_v34  ;;  %v58_v40 = vld [vmem:[#allocation2 + $0x70] sm:$0xff]  ;;  %v143_v43 = vld [vmem:[#allocation5 + $0x60] sm:$0xff] }
  0x30   :  { %367 = vmatpush3.bf16.msra.mxu1 %v366_v18  ;;  %v59_v41 = vld [vmem:[#allocation2 + $0x78] sm:$0xff]  ;;  %v378_v42 = vpack.c.bf16 %v142_v38, %v141_v37  ;;  %v144_v44 = vld [vmem:[#allocation5 + $0x68] sm:$0xff]  ;;  %v43_v47 = vld [vmem:[%s549_s0] sm:$0xff] }
  0x31   :  { %368 = vmatprep.subr.bf16.mxu1 %v470_v0  ;;  %v360_v45 = vpack.c.bf16 %v59_v41, %v58_v40  ;;  %v381_v46 = vpack.c.bf16 %v144_v44, %v143_v43  ;;  %v145_v48 = vld [vmem:[#allocation5 + $0x70] sm:$0xff]  ;;  %v146_v49 = vld [vmem:[#allocation5 + $0x78] sm:$0xff] }
  0x32   :  { %346 = vmatpush3.bf16.msra.mxu0 %v345_v14  ;;  %v384_v50 = vpack.c.bf16 %v146_v49, %v145_v48 }
  0x33   :  { %347 = vmatprep.subr.bf16.mxu0 %v470_v0 }
  0x34   :  { %370 = vmatpush3.bf16.msra.mxu1 %v369_v24 }
  0x35   :  { %371 = vmatprep.subr.bf16.mxu1 %v470_v0 }
  0x36   :  { %349 = vmatpush3.bf16.msra.mxu0 %v348_v21 }
  0x37   :  { %350 = vmatprep.subr.bf16.mxu0 %v470_v0 }
  0x38   :  { %373 = vmatpush3.bf16.msra.mxu1 %v372_v30 }
  0x39   :  { %374 = vmatprep.subr.bf16.mxu1 %v470_v0 }
  0x3a   :  { %352 = vmatpush3.bf16.msra.mxu0 %v351_v27 }
  0x3b   :  { %353 = vmatprep.subr.bf16.mxu0 %v470_v0 }
  0x3c   :  { %376 = vmatpush3.bf16.msra.mxu1 %v375_v36 }
  0x3d   :  { %377 = vmatprep.subr.bf16.mxu1 %v470_v0 }
  0x3e   :  { %355 = vmatpush3.bf16.msra.mxu0 %v354_v33 }
  0x3f   :  { %356 = vmatprep.subr.bf16.mxu0 %v470_v0 }
  0x40   :  { %379 = vmatpush3.bf16.msra.mxu1 %v378_v42 }
  0x41   :  { %380 = vmatprep.subr.bf16.mxu1 %v470_v0 }
  0x42   :  { %358 = vmatpush3.bf16.msra.mxu0 %v357_v39 }
  0x43   :  { %359 = vmatprep.subr.bf16.mxu0 %v470_v0 }
  0x44   :  { %382 = vmatpush3.bf16.msra.mxu1 %v381_v46 }
  0x45   :  { %383 = vmatprep.subr.bf16.mxu1 %v470_v0 }
  0x46   :  { %361 = vmatpush3.bf16.msra.mxu0 %v360_v45 }
  0x48   :  { %385 = vmatpush3.bf16.msra.mxu1 %v384_v50 }
  0x49   :  { %301 = vmatmul.mubr.f32.vlgmr.msra.gmra.mrb[0].mxu0 %v43_v47 }
 0x11c   :  { %v126_v51 = vpop.f32.mrb[0].mxu0 }
 0x11d   :  { %v130_v52 = vmax.f32 %v126_v51, 0.0  ;;  %v302_v53 = vpop.f32.mrb[1].mxu0 }
 0x11f   :  { %336 = vmatmul.mubr.f32.vlgmr.msra.gmra.mrb[0].mxu1 %v130_v52 }
 0x1f2   :  { %v213_v54 = vpop.f32.mrb[0].mxu1 }
 0x1f3   :  { %217 = vst [vmem:[#allocation7] sm:$0xff] %v213_v54  ;;  %v337_v55 = vpop.f32.mrb[1].mxu1 }
 0x1f4   :  { %449 = shalt.err (!%p446_p6)
}
 0x1f5   :  { %s450_s15 = scalar_lea.hbm %s552_s3, 128 }
 0x1f6   :  { %p451_p7 = scmp.ne.s32.totalorder %s552_s3, %s450_s15  ;;  %p454_p8 = scmp.lt.u32.totalorder %s450_s15, %s552_s3 }
 0x1f8   :  { %p456_p9 = pnand %p454_p8, %p451_p7 }
 0x1fa   :  { %459 = shalt.err (!%p456_p9)
}
 0x1fb   :  { %227 = dma.vmem_to_hbm [thread:$0]  %s225_s12, 128, %s552_s3, [#allocation4]  }
 0x1fc   :  { %464 = dma.done.wait [#allocation4], 128  }
 0x1fd   :  { %465 = vsyncadd [#allocation4], 4294967168 }
 0x1fe   :  { %231 = vsyncpa [#allocation3], 1 }
 0x1ff   :  { %232 = vsyncpa [#allocation6], 1 }
 0x200   :  { %233 = vsyncpa [#allocation4], 1 }

</bundles_post_ra>
